<compile_context>
chip_gen: v5e
topology: v5e:2x2
jax: 0.10.0
libtpu: 0.0.40
codegen_flags: <defaults>
</compile_context>

<pallas_src>
import jax
import jax.numpy as jnp
from jax.experimental import pallas as pl
from jax.experimental.pallas import tpu as pltpu


def _round_up(n, m):
    return ((n + m - 1) // m) * m


# -----------------------------------------------------------------------------
# Kernels
# -----------------------------------------------------------------------------
def _linear_single_block_kernel(x_ref, w_ref, b_ref, o_ref):
    # x_ref: (B, F)   w_ref: (F, C)   b_ref: (1, C) f32   o_ref: (B, C)
    acc = jnp.dot(x_ref[...], w_ref[...], preferred_element_type=jnp.float32)
    o_ref[...] = (acc + b_ref[...]).astype(o_ref.dtype)


def _linear_tiled_kernel(x_ref, w_ref, b_ref, o_ref, acc_ref):
    # Grid: (batch tiles ["parallel"], K tiles ["arbitrary", innermost]).
    # x_ref: (TB, TK)   w_ref: (TK, C_pad)   b_ref: (1, C_pad) f32
    # o_ref: (TB, C)    acc_ref: (TB, C_pad) f32 scratch
    k = pl.program_id(1)

    @pl.when(k == 0)
    def _init():
        acc_ref[...] = jnp.zeros_like(acc_ref)

    acc_ref[...] += jnp.dot(
        x_ref[...], w_ref[...], preferred_element_type=jnp.float32
    )

    @pl.when(k == pl.num_programs(1) - 1)
    def _finalize():
        out = acc_ref[...] + b_ref[...]
        # Narrow store: only the C real classes go back to HBM (masked vst when
        # C < 128); no padded writeback / wrapper re-slice.
        o_ref[...] = out[:, : o_ref.shape[1]].astype(o_ref.dtype)


# -----------------------------------------------------------------------------
# Module wrapper (weight layout prep hoisted out of the per-forward path)
# -----------------------------------------------------------------------------
class PallasLogisticRegression:
    """Pallas-TPU forward for nn.Linear(nFeatures, nClasses), PyTorch layout."""

    def __init__(self, weight, bias, *, block_b=1024, block_k=512,
                 compute_dtype=None):
        C, F = weight.shape
        assert bias.shape == (C,)
        self.F, self.C = int(F), int(C)
        self.C_pad = _round_up(self.C, 128)
        self.block_b = int(block_b)
        self.block_k = int(block_k)
        self.compute_dtype = compute_dtype

        # One-time layout prep: contraction dim on sublanes for the MXU.
        w_t = jnp.transpose(weight)                      # (F, C)
        if compute_dtype is not None:
            w_t = w_t.astype(compute_dtype)
        self.w_fc = w_t                                  # tiny path (unpadded)
        self.w_fc_pad = (
            w_t if self.C_pad == self.C
            else jnp.pad(w_t, ((0, 0), (0, self.C_pad - self.C))))
        b_f32 = bias.astype(jnp.float32)                 # bias add stays f32
        self.b_row = b_f32.reshape(1, self.C)
        self.b_row_pad = (
            b_f32 if self.C_pad == self.C
            else jnp.pad(b_f32, (0, self.C_pad - self.C))
        ).reshape(1, self.C_pad)

    # -- public API -----------------------------------------------------------
    def __call__(self, x):
        B, F = x.shape
        assert F == self.F
        out_dtype = x.dtype
        x_c = x if self.compute_dtype is None else x.astype(self.compute_dtype)
        if self._single_block_ok(B, x_c.dtype):
            return self._forward_single_block(x_c, out_dtype)
        return self._forward_tiled(x_c, out_dtype)

    # -- dispatch helpers -----------------------------------------------------
    def _single_block_ok(self, B, dtype):
        # Tiny problems: dispatch / pipeline overhead dominates, so use a single
        # grid-less block with no padding at all.
        itemsize = jnp.dtype(dtype).itemsize
        footprint = (B * self.F + self.F * self.C + B * self.C) * itemsize
        return B <= 512 and footprint <= (4 << 20)

    def _forward_single_block(self, x_c, out_dtype):
        B = x_c.shape[0]
        return pl.pallas_call(
            _linear_single_block_kernel,
            out_shape=jax.ShapeDtypeStruct((B, self.C), out_dtype),
        )(x_c, self.w_fc, self.b_row)

    def _forward_tiled(self, x_c, out_dtype):
        B = x_c.shape[0]
        F, C, C_pad = self.F, self.C, self.C_pad

        # --- K (feature) tiling: exact tiles only, so no OOB garbage can be
        #     accumulated. (Ragged *batch* tiles are fine: their writes are masked.)
        if F > self.block_k and F % self.block_k == 0:
            TK = self.block_k
        else:
            # TODO(synk): masked ragged-K tile for huge F not divisible by
            # block_k; here the full-F weight stays resident instead.
            TK = F
        num_k = F // TK

        # --- Batch tiling: no padding of x; ensure >= 2 steps when possible so
        #     the "parallel" axis can use both TensorCores on v7x.
        TB = min(self.block_b, _round_up(B, 8))
        if pl.cdiv(B, TB) < 2:
            TB = max(8, _round_up(pl.cdiv(B, 2), 8))
        grid = (pl.cdiv(B, TB), num_k)

        in_itemsize = jnp.dtype(x_c.dtype).itemsize
        w_itemsize = jnp.dtype(self.w_fc_pad.dtype).itemsize
        out_itemsize = jnp.dtype(out_dtype).itemsize

        # Resident weight/bias (constant index_map) need no prefetch buffer;
        # only request single-buffering when it actually saves meaningful VMEM.
        resident_w_bytes = TK * C_pad * w_itemsize
        single_buffer_resident = (num_k == 1) and resident_w_bytes >= (4 << 20)
        if single_buffer_resident:
            w_spec = pl.BlockSpec((TK, C_pad), lambda i, k: (k, 0),
                                  pipeline_mode=pl.Buffered(1))
            b_spec = pl.BlockSpec((1, C_pad), lambda i, k: (0, 0),
                                  pipeline_mode=pl.Buffered(1))
            w_bufs = 1
        else:
            w_spec = pl.BlockSpec((TK, C_pad), lambda i, k: (k, 0))
            b_spec = pl.BlockSpec((1, C_pad), lambda i, k: (0, 0))
            w_bufs = 2

        vmem_need = (2 * TB * TK * in_itemsize            # x tiles (double-buffered)
                     + w_bufs * TK * C_pad * w_itemsize   # weight
                     + w_bufs * C_pad * 4                 # bias (f32)
                     + 2 * TB * C * out_itemsize          # output tiles
                     + TB * C_pad * 4)                    # f32 accumulator scratch
        vmem_limit = int(min(64 << 20, max(32 << 20, 2 * vmem_need)))

        cost = pl.CostEstimate(
            flops=2 * B * F * C_pad,
            transcendentals=0,
            bytes_accessed=(B * F * in_itemsize + F * C_pad * w_itemsize
                            + C_pad * 4 + B * C * out_itemsize),
        )

        return pl.pallas_call(
            _linear_tiled_kernel,
            out_shape=jax.ShapeDtypeStruct((B, C), out_dtype),
            grid=grid,
            in_specs=[
                pl.BlockSpec((TB, TK), lambda i, k: (i, k)),   # x marches with grid
                w_spec,                                        # weight
                b_spec,                                        # bias
            ],
            out_specs=pl.BlockSpec((TB, C), lambda i, k: (i, 0)),
            scratch_shapes=[pltpu.VMEM((TB, C_pad), jnp.float32)],
            compiler_params=pltpu.CompilerParams(
                dimension_semantics=("parallel", "arbitrary"),
                vmem_limit_bytes=vmem_limit,
            ),
            cost_estimate=cost,
        )(x_c, self.w_fc_pad, self.b_row_pad)


def logistic_regression_forward(x, weight, bias, **kwargs):
    """Functional convenience wrapper (weight in PyTorch (nClasses, nFeatures) layout)."""
    return PallasLogisticRegression(weight, bias, **kwargs)(x)


# -----------------------------------------------------------------------------
# Self-test
# -----------------------------------------------------------------------------
if __name__ == "__main__":
    def init_linear(k, n_features, n_classes):
        kw, kb = jax.random.split(k)
        bound = 1.0 / (float(n_features) ** 0.5)
        w = jax.random.uniform(kw, (n_classes, n_features),
                               minval=-bound, maxval=bound, dtype=jnp.float32)
        b = jax.random.uniform(kb, (n_classes,),
                               minval=-bound, maxval=bound, dtype=jnp.float32)
        return w, b

    key = jax.random.PRNGKey(0)
    k0, k1, k2, k3, k4, k5 = jax.random.split(key, 6)

    # 1) Module's own shapes (B=4, F=32, C=8): single-block fast path, no padding.
    B, F, C = 4, 32, 8
    x = jax.random.normal(k0, (B, F), dtype=jnp.float32)
    w, b = init_linear(k1, F, C)
    out = jax.block_until_ready(logistic_regression_forward(x, w, b))
    ref = x @ w.T + b
    assert out.shape == (B, C)
    assert jnp.allclose(out, ref, atol=1e-4, rtol=1e-4), "single-block path mismatch"

    # 2) Tiled path: ragged last batch tile (masked writes) + narrow output store.
    B, F, C = 1000, 256, 10
    x = jax.random.normal(k2, (B, F), dtype=jnp.float32)
    w, b = init_linear(k3, F, C)
    model = PallasLogisticRegression(w, b)          # weight prep hoisted to init
    out = jax.block_until_ready(model(x))
    ref = x @ w.T + b
    assert out.shape == (B, C)
    assert jnp.allclose(out, ref, atol=3e-2, rtol=3e-2), "tiled (ragged-B) path mismatch"

    # 3) Tiled path: K-reduction grid axis (2 K tiles) + 2 batch steps (megacore).
    B, F, C = 640, 1024, 16
    x = jax.random.normal(k4, (B, F), dtype=jnp.float32)
    w, b = init_linear(k5, F, C)
    model = PallasLogisticRegression(w, b, block_k=512)
    out = jax.block_until_ready(model(x))
    ref = x @ w.T + b
    assert jnp.allclose(out, ref, atol=3e-2, rtol=3e-2), "tiled (K-grid) path mismatch"

    # 4) Optional bf16 input/weight path (f32 accumulation + f32 bias add).
    model_bf16 = PallasLogisticRegression(w, b, block_k=512,
                                          compute_dtype=jnp.bfloat16)
    out_bf16 = jax.block_until_ready(model_bf16(x))
    assert jnp.allclose(out_bf16, ref, atol=5e-2, rtol=5e-2), "bf16 path mismatch"

    print("KERNEL_OK")
</pallas_src>

<mosaic_0001>
module attributes {stable_mosaic.version = 11 : i64} {
  func.func @_linear_single_block_kernel(%arg0: memref<4x32xf32, #tpu.memory_space<vmem>>, %arg1: memref<32x8xf32, #tpu.memory_space<vmem>>, %arg2: memref<1x8xf32, #tpu.memory_space<vmem>>, %arg3: memref<4x8xf32, #tpu.memory_space<vmem>>) attributes {dimension_semantics = [], scalar_prefetch = 0 : i64, scratch_operands = 0 : i64, tpu.core_type = #tpu.core_type<tc>} {
    %c0 = arith.constant 0 : index
    %c0_0 = arith.constant 0 : index
    %0 = vector.load %arg0[%c0, %c0_0] : memref<4x32xf32, #tpu.memory_space<vmem>>, vector<4x32xf32>
    %c0_1 = arith.constant 0 : index
    %c0_2 = arith.constant 0 : index
    %1 = vector.load %arg1[%c0_1, %c0_2] : memref<32x8xf32, #tpu.memory_space<vmem>>, vector<32x8xf32>
    %cst = arith.constant dense<0.000000e+00> : vector<4x8xf32>
    %2 = tpu.matmul %0, %1, %cst {dimension_numbers = #tpu.dot_dimension_numbers<[1], [0], [0], [1], [0, 0, 1, 1], [], []>} : vector<4x32xf32>, vector<32x8xf32>, vector<4x8xf32> -> vector<4x8xf32>
    %c0_3 = arith.constant 0 : index
    %c0_4 = arith.constant 0 : index
    %3 = vector.load %arg2[%c0_3, %c0_4] : memref<1x8xf32, #tpu.memory_space<vmem>>, vector<1x8xf32>
    %4 = vector.broadcast %3 : vector<1x8xf32> to vector<4x8xf32>
    %5 = arith.addf %2, %4 : vector<4x8xf32>
    %c0_5 = arith.constant 0 : index
    %c0_6 = arith.constant 0 : index
    %6 = vector.load %arg3[%c0_5, %c0_6] : memref<4x8xf32, #tpu.memory_space<vmem>>, vector<4x8xf32>
    tpu.vector_store %arg3[%c0_5, %c0_6], %5 {strides = array<i32>} : memref<4x8xf32, #tpu.memory_space<vmem>>, vector<4x8xf32>,
    return
  }
}

</mosaic_0001>

<bundles_post_ra>
// kernel: tpu_custom_call.1
= control target key start
LH: loop header
LB: loop body
LE: loop exit
PB: predicated region body
PF: predicated region fallthrough
CT: control target
= control target key end

     0   :  { %s137_s0 = inlined_call_operand.vmem [shape: f32[4,32], index: 0, kind: input, shape index: {}]   ;;  %s138_s1 = inlined_call_operand.vmem [shape: f32[32,8], index: 1, kind: input, shape index: {}]   ;;  %s139_s2 = inlined_call_operand.vmem [shape: f32[1,8], index: 2, kind: input, shape index: {}]   ;;  %s140_s3 = inlined_call_operand.hbm [shape: f32[4,8], index: 3, kind: output, shape index: {}]  }
   0x1   :  { %v19_v0 = vld [vmem:[%s138_s1 + $0x18] sm:$0xff]  ;;  %v18_v1 = vld [vmem:[%s138_s1 + $0x10] sm:$0xff]  ;;  %v17_v2 = vld [vmem:[%s138_s1 + $0x8] sm:$0xff] }
   0x2   :  { %40 = vmatpush.msra.mxu0 %v19_v0 }
   0x3   :  { %8 = vsyncpa [#allocation3], 0  ;;  %v16_v3 = vld [vmem:[%s138_s1] sm:$0xff]  ;;  %vm24_vm0 = vcmask 261120   ;;  %s95_s24 = smov [#allocation2]   ;;  %s57_s28 = sshll.u32 %s140_s3, 4  ;;  %s58_s28 = int_to_ptr.hbm [resolvable:$true] %s57_s28 }
   0x4   :  { %41 = vmatpush.msra.mxu0 %v18_v1  ;;  %v15_v4 = vld [vmem:[%s137_s0] sm:$0xf]  ;;  %s55_s25 = sshll.u32 %s95_s24, 4  ;;  %vm48_vm1 = vcmask 60416   ;;  %s56_s25 = int_to_ptr.vmem [resolvable:$true] %s55_s25 }
   0x5   :  { %v68_v5 = vld [vmem:[%s139_s2] ss:$0 sm:$0xff] }
   0x6   :  { %42 = vmatpush.msra.mxu0 %v17_v2 }
   0x8   :  { %43 = vmatpush.msra.mxu0 %v16_v3 }
   0x9   :  { %66 = vmatmul.msk.f32.vlgmr.msra.gmra.mxu0 %vm24_vm0, %v15_v4 }
  0x86   :  { %v45_v6 = vpop.f32.mrf.mxu0 }
  0x87   :  { %v46_v7 = vadd.f32 %v68_v5, %v45_v6 }
  0x89   :  { %49 = vst.msk [vmem:[#allocation2] sm:$0xf] %vm48_vm1, %v46_v7 }
  0x8a   :  { %60 = dma.vmem_to_hbm [thread:$0]  %s56_s25, 64, %s58_s28, [#allocation3]  }
  0x8b   :  { %93 = dma.done.wait [#allocation3], 64  }
  0x8c   :  { %94 = vsyncadd [#allocation3], 4294967232 }
  0x8d   :  { %65 = vsyncpa [#allocation3], 1 }

</bundles_post_ra>
